<compile_context>
chip_gen: v7x
topology: tpu7x:2x2x1
jax: 0.10.0
libtpu: 0.0.40
codegen_flags: <defaults>
</compile_context>

<pallas_src>
import jax
import jax.numpy as jnp
from jax import lax
from jax.experimental import pallas as pl
from jax.experimental.pallas import tpu as pltpu

GAMMA = 0.99
LMBDA = 0.95


def _round_up(x, m):
    return (x + m - 1) // m * m


# --------------------------------------------------------------------------
# Kernel 1: fused value network for obs AND next_obs
#   V(x) = tanh(x @ W1 + b1) @ W2 + b2
# --------------------------------------------------------------------------
def value_mlp_pair_kernel(x_ref, xn_ref, w1_ref, b1_ref, w2_ref, b2_ref,
                          v_ref, vn_ref):
    w1 = w1_ref[...]          # (D, H)
    b1 = b1_ref[...]          # (1, H)
    w2 = w2_ref[...]          # (1, H) row  (W2 transposed on the host)
    b2 = b2_ref[0, 0]         # SMEM scalar

    # obs stream: hidden activations on the MXU + VPU tanh.
    h = jnp.tanh(jnp.dot(x_ref[...], w1,
                         preferred_element_type=jnp.float32) + b1)  # (tm, H)
    # H -> 1 projection emitted LANE-DENSE: contract H of (1,H) x (tm,H)
    # ("NT" dot, same pattern as q @ k^T) so per-row values land directly on
    # the lane axis as a (1, tm) row -> unmasked full-width stores, and no
    # (tm,1)->(1,tm) relayout is needed.
    v_ref[...] = lax.dot_general(
        w2, h, (((1,), (1,)), ((), ())),
        preferred_element_type=jnp.float32) + b2                    # (1, tm)

    # next-obs stream (same weights, already resident in VMEM).
    hn = jnp.tanh(jnp.dot(xn_ref[...], w1,
                          preferred_element_type=jnp.float32) + b1)
    vn_ref[...] = lax.dot_general(
        w2, hn, (((1,), (1,)), ((), ())),
        preferred_element_type=jnp.float32) + b2


def value_mlp_pair(x, xn, w1, b1, w2, b2, row_tile=4096,
                   vmem_budget_bytes=10 << 20):
    """Returns V(x), V(xn) as flat (N,) arrays for row-flattened (N, D) inputs."""
    n, d = x.shape
    hdim = w1.shape[1]

    # Row-tile selection:
    #  * large default (4096) to amortize the ~0.35us per-grid-step overhead,
    #  * capped so 2 input streams x 2 pipeline buffers of (tm, D) f32 stay
    #    well inside v5e's 16 MiB scoped-VMEM default,
    #  * multiple of 128 so the lane-dense (1, tm) output block is unmasked,
    #  * split in two when one tile would cover everything so v7x's two
    #    TensorCores both get a grid step on the "parallel" axis.
    n128 = _round_up(max(n, 1), 128)
    tm_cap = max(128, (vmem_budget_bytes // (2 * 2 * d * 4)) // 128 * 128)
    tm = max(128, min(row_tile, tm_cap, n128) // 128 * 128)
    if tm == n128 and n128 >= 256:
        tm = _round_up(n128 // 2, 128)
    n_pad = _round_up(n, tm)

    if n_pad != n:
        pad = ((0, n_pad - n), (0, 0))
        x = jnp.pad(x, pad)
        xn = jnp.pad(xn, pad)

    w2_row = w2.reshape(1, hdim)
    b2_s = b2.reshape(1, 1)

    row_spec = pl.BlockSpec((tm, d), lambda i: (i, 0))
    out_spec = pl.BlockSpec((1, tm), lambda i: (0, i))   # lane-dense value rows

    v, vn = pl.pallas_call(
        value_mlp_pair_kernel,
        out_shape=(jax.ShapeDtypeStruct((1, n_pad), jnp.float32),
                   jax.ShapeDtypeStruct((1, n_pad), jnp.float32)),
        grid_spec=pltpu.PrefetchScalarGridSpec(
            num_scalar_prefetch=0,
            grid=(n_pad // tm,),
            in_specs=[
                row_spec,                                           # obs rows
                row_spec,                                           # next-obs rows
                pl.BlockSpec((d, hdim), lambda i: (0, 0)),          # W1 (resident)
                pl.BlockSpec((1, hdim), lambda i: (0, 0)),          # b1
                pl.BlockSpec((1, hdim), lambda i: (0, 0)),          # W2 row
                pl.BlockSpec(memory_space=pltpu.MemorySpace.SMEM),  # b2 scalar
            ],
            out_specs=(out_spec, out_spec)),
        compiler_params=pltpu.CompilerParams(
            dimension_semantics=("parallel",)),
    )(x, xn, w1, b1, w2_row, b2_s)
    return v[0, :n], vn[0, :n]


# --------------------------------------------------------------------------
# Kernel 2: GAE backward recursion over time, time-major [T, B_pad] tiles
# --------------------------------------------------------------------------
def gae_kernel(value_ref, next_value_ref, reward_ref, done_ref,
               adv_ref, vt_ref, coef_ref):
    T, TB = value_ref.shape

    # Vectorized pre-pass on full (T, TB) tiles (whole (8,128) vregs):
    #   delta_t stored into adv_ref (refined in place below),
    #   coef_t  = gamma * lmbda * (1 - done_t) in VMEM scratch.
    not_done = 1.0 - done_ref[...]
    coef_ref[...] = (GAMMA * LMBDA) * not_done
    adv_ref[...] = (reward_ref[...]
                    + GAMMA * not_done * next_value_ref[...]
                    - value_ref[...])

    if T >= 64:
        # Long-horizon path: log-depth first-order linear-recurrence scan
        # (Hillis-Steele doubling) over the time (sublane) axis -- ~log2(T)
        # vectorized passes over whole (T, TB) tiles instead of T serial
        # latency-bound steps.
        a = adv_ref[...]            # window sums  (start at delta_t)
        c = coef_ref[...]           # window coefficient products
        s = 1
        while s < T:
            zpad = jnp.zeros((s, TB), jnp.float32)
            a_sh = jnp.concatenate([a[s:, :], zpad], axis=0)   # shift by s, zero-fill
            c_sh = jnp.concatenate([c[s:, :], zpad], axis=0)
            a = a + c * a_sh
            c = c * c_sh
            s *= 2
        adv_ref[...] = a
    else:
        # Short-horizon path: serial backward recursion, one (1, TB) row per
        # step.  Small T fully unrolled (static slices); medium T via
        # fori_loop with modest unroll to keep vreg pressure flat.
        def step(t, prev_adv):
            adv = adv_ref[pl.ds(t, 1), :] + coef_ref[pl.ds(t, 1), :] * prev_adv
            adv_ref[pl.ds(t, 1), :] = adv
            return adv

        prev = jnp.zeros((1, TB), jnp.float32)
        if T <= 16:
            for i in range(T):
                prev = step(T - 1 - i, prev)
        else:
            lax.fori_loop(0, T, lambda i, p: step(T - 1 - i, p), prev,
                          unroll=8)

    vt_ref[...] = adv_ref[...] + value_ref[...]


def gae_scan(value_tb, next_value_tb, reward_tb, done_tb, batch_tile=512,
             vmem_budget_bytes=10 << 20):
    T, B = value_tb.shape

    # Batch-tile selection:
    #  * 512 lanes (4 vregs) per serial time-step row instead of 128 -- the
    #    recursion is latency-bound, so wider tiles do 4x the useful work for
    #    the same loop-carried latency,
    #  * capped so the ~13 double-buffered (T, TB) blocks + scratch and the
    #    doubling-scan temporaries stay inside scoped VMEM on every chip,
    #  * split in two when one tile would cover everything so v7x's two
    #    TensorCores both get a tile.
    b128 = _round_up(max(B, 1), 128)
    tb_cap = max(128, (vmem_budget_bytes // (17 * T * 4)) // 128 * 128)
    tb = max(128, min(batch_tile, tb_cap, b128) // 128 * 128)
    if tb == b128 and b128 >= 256:
        tb = _round_up(b128 // 2, 128)
    b_pad = _round_up(B, tb)

    if b_pad != B:
        pad = ((0, 0), (0, b_pad - B))
        value_tb, next_value_tb, reward_tb, done_tb = (
            jnp.pad(a, pad)
            for a in (value_tb, next_value_tb, reward_tb, done_tb))

    spec = pl.BlockSpec((T, tb), lambda b: (0, b))
    adv, vt = pl.pallas_call(
        gae_kernel,
        out_shape=(jax.ShapeDtypeStruct((T, b_pad), jnp.float32),
                   jax.ShapeDtypeStruct((T, b_pad), jnp.float32)),
        grid_spec=pltpu.PrefetchScalarGridSpec(
            num_scalar_prefetch=0,
            grid=(b_pad // tb,),
            in_specs=[spec, spec, spec, spec],
            out_specs=(spec, spec),
            scratch_shapes=[pltpu.VMEM((T, tb), jnp.float32)]),
        compiler_params=pltpu.CompilerParams(
            dimension_semantics=("parallel",)),
    )(value_tb, next_value_tb, reward_tb, done_tb)
    return adv[:, :B], vt[:, :B]


# --------------------------------------------------------------------------
# GAE module forward (glue in plain JAX)
# --------------------------------------------------------------------------
def gae_forward(obs, next_obs, reward, done, params,
                average_rewards=False, gradient_mode=False):
    B, T, D = obs.shape
    w1, b1, w2, b2 = params

    if average_rewards:
        r = reward - reward.mean()
        # torch .std() is unbiased (ddof=1), clamped at 1e-4
        reward = r / jnp.maximum(jnp.std(r, ddof=1), 1e-4)

    # One fused pallas_call evaluates V(obs) and V(next_obs); outputs come
    # back as flat lane-dense rows and are reshaped for free on the host.
    value_flat, next_value_flat = value_mlp_pair(
        obs.reshape(B * T, D), next_obs.reshape(B * T, D), w1, b1, w2, b2)
    value = value_flat.reshape(B, T, 1)
    next_value = next_value_flat.reshape(B, T, 1)
    done_f = done.astype(jnp.float32)

    # TODO(synk): fold these [B,T] <-> [T,B] glue transposes into the GAE
    # kernel (read (tb, T) blocks straight from [B,T] and transpose on the
    # idle XLU); kept host-side here for lowering robustness -- they are
    # D-times smaller than the obs traffic.
    to_tb = lambda x: jnp.transpose(x[..., 0], (1, 0))        # [B,T,1] -> [T,B]
    from_tb = lambda x: jnp.transpose(x, (1, 0))[..., None]   # [T,B] -> [B,T,1]

    adv_tb, vt_tb = gae_scan(
        to_tb(value), to_tb(next_value), to_tb(reward), to_tb(done_f))
    adv = from_tb(adv_tb)
    value_target = from_tb(vt_tb)

    out = {"reward": reward, "state_value": value, "advantage": adv}
    if gradient_mode:
        out["value_error"] = value_target - value
    return out


# --------------------------------------------------------------------------
# Pure-JAX reference (for a silent sanity check)
# --------------------------------------------------------------------------
def gae_reference(obs, next_obs, reward, done, params):
    w1, b1, w2, b2 = params
    mlp = lambda x: jnp.tanh(x @ w1 + b1) @ w2 + b2
    B, T, D = obs.shape
    value = mlp(obs.reshape(B * T, D)).reshape(B, T, 1)
    next_value = mlp(next_obs.reshape(B * T, D)).reshape(B, T, 1)
    not_done = 1.0 - done.astype(jnp.float32)
    delta = reward + GAMMA * not_done * next_value - value

    def step(carry, xs):
        d, nd = xs
        adv = d + GAMMA * LMBDA * nd * carry
        return adv, adv

    _, adv_rev = lax.scan(
        step,
        jnp.zeros((B, 1), jnp.float32),
        (jnp.flip(jnp.swapaxes(delta, 0, 1), 0),
         jnp.flip(jnp.swapaxes(not_done, 0, 1), 0)),
    )
    adv = jnp.swapaxes(jnp.flip(adv_rev, 0), 0, 1)
    return adv, value


if __name__ == "__main__":
    key = jax.random.PRNGKey(0)
    kobs, knobs, krew, kdone, kw1, kw2 = jax.random.split(key, 6)

    B, T, D, H = 2, 8, 32, 32

    obs = jax.random.normal(kobs, (B, T, D), jnp.float32)
    next_obs = jax.random.normal(knobs, (B, T, D), jnp.float32)
    reward = jax.random.normal(krew, (B, T, 1), jnp.float32)
    done = jax.random.bernoulli(kdone, 0.1, (B, T, 1))

    # deterministic value-network parameters (Linear(D,H) -> tanh -> Linear(H,1))
    w1 = 0.1 * jax.random.normal(kw1, (D, H), jnp.float32)
    b1 = jnp.zeros((1, H), jnp.float32)
    w2 = 0.1 * jax.random.normal(kw2, (H, 1), jnp.float32)
    b2 = jnp.zeros((1, 1), jnp.float32)
    params = (w1, b1, w2, b2)

    out = gae_forward(obs, next_obs, reward, done, params,
                      average_rewards=False, gradient_mode=True)
    jax.block_until_ready(out)

    # silent correctness check against a pure-JAX reference
    adv_ref, value_ref = gae_reference(obs, next_obs, reward, done, params)
    assert jnp.allclose(out["state_value"], value_ref, atol=1e-4, rtol=1e-4)
    assert jnp.allclose(out["advantage"], adv_ref, atol=1e-4, rtol=1e-4)
    assert jnp.allclose(out["value_error"], adv_ref, atol=1e-4, rtol=1e-4)

    print("KERNEL_OK")
</pallas_src>

<mosaic_0001>
module attributes {stable_mosaic.version = 11 : i64} {
  func.func @value_mlp_pair_kernel(%arg0: i32, %arg1: memref<128x32xf32, #tpu.memory_space<vmem>>, %arg2: memref<128x32xf32, #tpu.memory_space<vmem>>, %arg3: memref<32x32xf32, #tpu.memory_space<vmem>>, %arg4: memref<1x32xf32, #tpu.memory_space<vmem>>, %arg5: memref<1x32xf32, #tpu.memory_space<vmem>>, %arg6: memref<1x1xf32, #tpu.memory_space<smem>>, %arg7: memref<1x128xf32, #tpu.memory_space<vmem>>, %arg8: memref<1x128xf32, #tpu.memory_space<vmem>>) attributes {dimension_semantics = [#tpu.dimension_semantics<parallel>], iteration_bounds = array<i64: 1>, scalar_prefetch = 0 : i64, scratch_operands = 0 : i64, tpu.core_type = #tpu.core_type<tc>, window_params = [{transform_indices = @transform_0, window_bounds = array<i64: 128, 32>}, {transform_indices = @transform_1, window_bounds = array<i64: 128, 32>}, {pipeline_mode = #tpu.pipeline_mode<synchronous>, transform_indices = @transform_2, window_bounds = array<i64: 32, 32>}, {pipeline_mode = #tpu.pipeline_mode<synchronous>, transform_indices = @transform_3, window_bounds = array<i64: 1, 32>}, {pipeline_mode = #tpu.pipeline_mode<synchronous>, transform_indices = @transform_4, window_bounds = array<i64: 1, 32>}, {transform_indices = @transform_5, window_bounds = array<i64: 1, 1>}, {transform_indices = @transform_6, window_bounds = array<i64: 1, 128>}, {transform_indices = @transform_7, window_bounds = array<i64: 1, 128>}]} {
    %c0 = arith.constant 0 : index
    %c0_0 = arith.constant 0 : index
    %0 = vector.load %arg3[%c0, %c0_0] : memref<32x32xf32, #tpu.memory_space<vmem>>, vector<32x32xf32>
    %c0_1 = arith.constant 0 : index
    %c0_2 = arith.constant 0 : index
    %1 = vector.load %arg4[%c0_1, %c0_2] : memref<1x32xf32, #tpu.memory_space<vmem>>, vector<1x32xf32>
    %c0_3 = arith.constant 0 : index
    %c0_4 = arith.constant 0 : index
    %2 = vector.load %arg5[%c0_3, %c0_4] : memref<1x32xf32, #tpu.memory_space<vmem>>, vector<1x32xf32>
    %c0_5 = arith.constant 0 : index
    %c0_6 = arith.constant 0 : index
    %3 = memref.load %arg6[%c0_5, %c0_6] : memref<1x1xf32, #tpu.memory_space<smem>>
    %c0_7 = arith.constant 0 : index
    %c0_8 = arith.constant 0 : index
    %4 = vector.load %arg1[%c0_7, %c0_8] : memref<128x32xf32, #tpu.memory_space<vmem>>, vector<128x32xf32>
    %cst = arith.constant dense<0.000000e+00> : vector<128x32xf32>
    %5 = tpu.matmul %4, %0, %cst {dimension_numbers = #tpu.dot_dimension_numbers<[1], [0], [0], [1], [0, 0, 1, 1], [], []>} : vector<128x32xf32>, vector<32x32xf32>, vector<128x32xf32> -> vector<128x32xf32>
    %6 = vector.broadcast %1 : vector<1x32xf32> to vector<128x32xf32>
    %7 = arith.addf %5, %6 : vector<128x32xf32>
    %8 = math.tanh %7 : vector<128x32xf32>
    %cst_9 = arith.constant dense<0.000000e+00> : vector<1x128xf32>
    %9 = tpu.matmul %2, %8, %cst_9 {dimension_numbers = #tpu.dot_dimension_numbers<[1], [1], [0], [0], [0, 0, 1, 0], [], []>} : vector<1x32xf32>, vector<128x32xf32>, vector<1x128xf32> -> vector<1x128xf32>
    %10 = vector.broadcast %3 : f32 to vector<1x128xf32>
    %11 = arith.addf %9, %10 : vector<1x128xf32>
    %c0_10 = arith.constant 0 : index
    %c0_11 = arith.constant 0 : index
    %12 = vector.load %arg7[%c0_10, %c0_11] : memref<1x128xf32, #tpu.memory_space<vmem>>, vector<1x128xf32>
    tpu.vector_store %arg7[%c0_10, %c0_11], %11 {strides = array<i32>} : memref<1x128xf32, #tpu.memory_space<vmem>>, vector<1x128xf32>,
    %c0_12 = arith.constant 0 : index
    %c0_13 = arith.constant 0 : index
    %13 = vector.load %arg2[%c0_12, %c0_13] : memref<128x32xf32, #tpu.memory_space<vmem>>, vector<128x32xf32>
    %cst_14 = arith.constant dense<0.000000e+00> : vector<128x32xf32>
    %14 = tpu.matmul %13, %0, %cst_14 {dimension_numbers = #tpu.dot_dimension_numbers<[1], [0], [0], [1], [0, 0, 1, 1], [], []>} : vector<128x32xf32>, vector<32x32xf32>, vector<128x32xf32> -> vector<128x32xf32>
    %15 = vector.broadcast %1 : vector<1x32xf32> to vector<128x32xf32>
    %16 = arith.addf %14, %15 : vector<128x32xf32>
    %17 = math.tanh %16 : vector<128x32xf32>
    %cst_15 = arith.constant dense<0.000000e+00> : vector<1x128xf32>
    %18 = tpu.matmul %2, %17, %cst_15 {dimension_numbers = #tpu.dot_dimension_numbers<[1], [1], [0], [0], [0, 0, 1, 0], [], []>} : vector<1x32xf32>, vector<128x32xf32>, vector<1x128xf32> -> vector<1x128xf32>
    %19 = vector.broadcast %3 : f32 to vector<1x128xf32>
    %20 = arith.addf %18, %19 : vector<1x128xf32>
    %c0_16 = arith.constant 0 : index
    %c0_17 = arith.constant 0 : index
    %21 = vector.load %arg8[%c0_16, %c0_17] : memref<1x128xf32, #tpu.memory_space<vmem>>, vector<1x128xf32>
    tpu.vector_store %arg8[%c0_16, %c0_17], %20 {strides = array<i32>} : memref<1x128xf32, #tpu.memory_space<vmem>>, vector<1x128xf32>,
    return
  }
  func.func @transform_0(%arg0: i32) -> (i32, i32) {
    %c0_i32 = arith.constant 0 : i32
    %c0_i32_0 = arith.constant 0 : i32
    return %arg0, %c0_i32 : i32, i32
  }
  func.func @transform_1(%arg0: i32) -> (i32, i32) {
    %c0_i32 = arith.constant 0 : i32
    %c0_i32_0 = arith.constant 0 : i32
    return %arg0, %c0_i32 : i32, i32
  }
  func.func @transform_2(%arg0: i32) -> (i32, i32) {
    %c0_i32 = arith.constant 0 : i32
    %c0_i32_0 = arith.constant 0 : i32
    %c0_i32_1 = arith.constant 0 : i32
    return %c0_i32, %c0_i32_0 : i32, i32
  }
  func.func @transform_3(%arg0: i32) -> (i32, i32) {
    %c0_i32 = arith.constant 0 : i32
    %c0_i32_0 = arith.constant 0 : i32
    %c0_i32_1 = arith.constant 0 : i32
    return %c0_i32, %c0_i32_0 : i32, i32
  }
  func.func @transform_4(%arg0: i32) -> (i32, i32) {
    %c0_i32 = arith.constant 0 : i32
    %c0_i32_0 = arith.constant 0 : i32
    %c0_i32_1 = arith.constant 0 : i32
    return %c0_i32, %c0_i32_0 : i32, i32
  }
  func.func @transform_5(%arg0: i32) -> (i32, i32) {
    %c0_i32 = arith.constant 0 : i32
    %c0_i32_0 = arith.constant 0 : i32
    %c0_i32_1 = arith.constant 0 : i32
    return %c0_i32, %c0_i32_0 : i32, i32
  }
  func.func @transform_6(%arg0: i32) -> (i32, i32) {
    %c0_i32 = arith.constant 0 : i32
    %c0_i32_0 = arith.constant 0 : i32
    return %c0_i32, %arg0 : i32, i32
  }
  func.func @transform_7(%arg0: i32) -> (i32, i32) {
    %c0_i32 = arith.constant 0 : i32
    %c0_i32_0 = arith.constant 0 : i32
    return %c0_i32, %arg0 : i32, i32
  }
}

</mosaic_0001>

<bundles_post_ra>
// kernel: tpu_custom_call.1
= control target key start
LH: loop header
LB: loop body
LE: loop exit
PB: predicated region body
PF: predicated region fallthrough
CT: control target
= control target key end

     0   :  { %14 = vsyncpa [#allocation4], 0  ;;  %vm57_vm0 = vcmask 261120   ;;  %s1550_s0 = inlined_call_operand.vmem [shape: f32[128,32], index: 0, kind: input, shape index: {}]   ;;  %s1551_s1 = inlined_call_operand.vmem [shape: f32[128,32], index: 1, kind: input, shape index: {}]   ;;  %s1552_s2 = inlined_call_operand.vmem [shape: f32[32,32], index: 2, kind: input, shape index: {}]   ;;  %s1553_s3 = inlined_call_operand.vmem [shape: f32[1,32], index: 3, kind: input, shape index: {}]   ;;  %s1554_s4 = inlined_call_operand.vmem [shape: f32[1,32], index: 4, kind: input, shape index: {}]   ;;  %s1555_s5 = inlined_call_operand.<no memory space> [shape: f32[1,1], index: 5, kind: input, shape index: {}]   ;;  %s1556_s6 = inlined_call_operand.hbm [shape: f32[1,128], index: 6, kind: output, shape index: {0}]   ;;  %s1557_s7 = inlined_call_operand.hbm [shape: f32[1,128], index: 7, kind: output, shape index: {1}]  }
   0x1   :  { %v28_v0 = vld [vmem:[%s1552_s2] sm:$0xff]  ;;  %v29_v1 = vld [vmem:[%s1552_s2 + $0x8] sm:$0xff]  ;;  %v30_v2 = vld [vmem:[%s1552_s2 + $0x10] sm:$0xff] }
   0x2   :  { %v1037_v3 = vpack.c.bf16 %v29_v1, %v28_v0  ;;  %v31_v4 = vld [vmem:[%s1552_s2 + $0x18] sm:$0xff]  ;;  %v35_v5 = vld [vmem:[%s1550_s0] sm:$0xff]  ;;  %v36_v8 = vld [vmem:[%s1550_s0 + $0x8] sm:$0xff] }
   0x3   :  { %v390_v6 = vld [vmem:[%s1551_s1] sm:$0xff]  ;;  %v1041_v7 = vpack.c.bf16 %v31_v4, %v30_v2  ;;  %911 = vmatprep.mubr.msk.f32.mxu1 %vm57_vm0, %v35_v5  ;;  %v391_v9 = vld [vmem:[%s1551_s1 + $0x8] sm:$0xff]  ;;  %v37_v10 = vld [vmem:[%s1550_s0 + $0x10] sm:$0xff] }
   0x4   :  { %978 = vmatprep.mubr.msk.f32.mxu0 %vm57_vm0, %v390_v6  ;;  %1038 = vmatprep.subr.bf16.mxu1 %v1037_v3  ;;  %v392_v11 = vld [vmem:[%s1551_s1 + $0x10] sm:$0xff]  ;;  %v38_v12 = vld [vmem:[%s1550_s0 + $0x18] sm:$0xff] }
   0x5   :  { %1078 = vmatprep.subr.bf16.mxu0 %v1037_v3  ;;  %1040 = vmatpush3.bf16.msra.mxu1 %v1037_v3  ;;  %v393_v13 = vld [vmem:[%s1551_s1 + $0x18] sm:$0xff] }
   0x6   :  { %1080 = vmatpush3.bf16.msra.mxu0 %v1037_v3  ;;  %1042 = vmatprep.subr.bf16.mxu1 %v1041_v7 }
   0x7   :  { %1082 = vmatprep.subr.bf16.mxu0 %v1041_v7 }
   0x9   :  { %1044 = vmatpush3.bf16.msra.mxu1 %v1041_v7 }
   0xa   :  { %1084 = vmatpush3.bf16.msra.mxu0 %v1041_v7 }
   0xc   :  { %912 = vmatmul.mubr.msk.f32.vlgmr.msra.gmra.mrb[0].mxu1 %vm57_vm0, %v36_v8 }
   0xd   :  { %979 = vmatmul.mubr.msk.f32.vlgmr.msra.gmra.mrb[0].mxu0 %vm57_vm0, %v391_v9  ;;  %914 = vmatprep.mubr.msk.f32.mxu1 %vm57_vm0, %v37_v10 }
   0xe   :  { %981 = vmatprep.mubr.msk.f32.mxu0 %vm57_vm0, %v392_v11 }
   0xf   :  { %15 = vsyncpa [#allocation6], 0  ;;  %v39_v14 = vld [vmem:[%s1550_s0 + $0x20] sm:$0xff]  ;;  %v40_v16 = vld [vmem:[%s1550_s0 + $0x28] sm:$0xff]  ;;  %v1234_v38 = vmov 0.0|0.0   ;;  %vm1235_vm1 = vmmov 0  }
  0x10   :  { %v394_v15 = vld [vmem:[%s1551_s1 + $0x20] sm:$0xff]  ;;  %915 = vmatmul.mubr.msk.f32.gmra.mrb[2].mxu1 %vm57_vm0, %v38_v12  ;;  %v395_v17 = vld [vmem:[%s1551_s1 + $0x28] sm:$0xff]  ;;  %v41_v18 = vld [vmem:[%s1550_s0 + $0x30] sm:$0xff]  ;;  %1045 = vmatprep.subr.bf16.mxu1 %v1234_v38  ;;  %v1236_v39 = vmov 0.0   ;;  %s1237_s27 = smov [#allocation3]   ;;  %s1238_s29 = smov [#allocation5]  }
  0x11   :  { %982 = vmatmul.mubr.msk.f32.gmra.mrb[2].mxu0 %vm57_vm0, %v393_v13  ;;  %917 = vmatprep.mubr.msk.f32.mxu1 %vm57_vm0, %v39_v14  ;;  %v396_v19 = vld [vmem:[%s1551_s1 + $0x30] sm:$0xff]  ;;  %v42_v20 = vld [vmem:[%s1550_s0 + $0x38] sm:$0xff]  ;;  %v43_v22 = vld [vmem:[%s1550_s0 + $0x40] sm:$0xff]  ;;  %s740_s28 = sshll.u32 %s1237_s27, 4  ;;  %s750_s30 = sshll.u32 %s1238_s29, 4  ;;  %s741_s28 = int_to_ptr.vmem [resolvable:$true] %s740_s28  ;;  %s1518_s30 = int_to_ptr.vmem [resolvable:$true] %s750_s30 }
  0x12   :  { %984 = vmatprep.mubr.msk.f32.mxu0 %vm57_vm0, %v394_v15  ;;  %v397_v21 = vld [vmem:[%s1551_s1 + $0x38] sm:$0xff]  ;;  %v398_v23 = vld [vmem:[%s1551_s1 + $0x40] sm:$0xff]  ;;  %v44_v24 = vld [vmem:[%s1550_s0 + $0x48] sm:$0xff]  ;;  %1085 = vmatprep.subr.bf16.mxu0 %v1234_v38  ;;  %s1190_s8 = scalar_lea.vmem %s741_s28, 32  ;;  %p1191_p1 = scmp.lt.s32.totalorder %s741_s28, %s741_s28 }
  0x13   :  { %v399_v25 = vld [vmem:[%s1551_s1 + $0x48] sm:$0xff]  ;;  %v45_v26 = vld [vmem:[%s1550_s0 + $0x50] sm:$0xff]  ;;  %v46_v28 = vld [vmem:[%s1550_s0 + $0x58] sm:$0xff] }
  0x14   :  { %918 = vmatmul.mubr.msk.f32.gmra.mrb[4].mxu1 %vm57_vm0, %v40_v16  ;;  %v400_v27 = vld [vmem:[%s1551_s1 + $0x50] sm:$0xff]  ;;  %v401_v29 = vld [vmem:[%s1551_s1 + $0x58] sm:$0xff]  ;;  %v47_v30 = vld [vmem:[%s1550_s0 + $0x60] sm:$0xff] }
  0x15   :  { %985 = vmatmul.mubr.msk.f32.gmra.mrb[4].mxu0 %vm57_vm0, %v395_v17  ;;  %920 = vmatprep.mubr.msk.f32.mxu1 %vm57_vm0, %v41_v18  ;;  %v402_v31 = vld [vmem:[%s1551_s1 + $0x60] sm:$0xff]  ;;  %v48_v32 = vld [vmem:[%s1550_s0 + $0x68] sm:$0xff]  ;;  %v49_v34 = vld [vmem:[%s1550_s0 + $0x70] sm:$0xff] }
  0x16   :  { %987 = vmatprep.mubr.msk.f32.mxu0 %vm57_vm0, %v396_v19  ;;  %v403_v33 = vld [vmem:[%s1551_s1 + $0x68] sm:$0xff]  ;;  %v404_v35 = vld [vmem:[%s1551_s1 + $0x70] sm:$0xff]  ;;  %v50_v36 = vld [vmem:[%s1550_s0 + $0x78] sm:$0xff] }
  0x17   :  { %v405_v37 = vld [vmem:[%s1551_s1 + $0x78] sm:$0xff]  ;;  %v1424_v40 = vld [vmem:[%s1553_s3] ss:$0 sm:$0xff]  ;;  %vm1444_vm2 = vmpackc.low %vm57_vm0, %vm57_vm0 }
  0x18   :  { %921 = vmatmul.mubr.msk.f32.gmra.mrb[6].mxu1 %vm57_vm0, %v42_v20 }
  0x19   :  { %988 = vmatmul.mubr.msk.f32.gmra.mrb[6].mxu0 %vm57_vm0, %v397_v21  ;;  %923 = vmatprep.mubr.msk.f32.mxu1 %vm57_vm0, %v43_v22 }
  0x1a   :  { %990 = vmatprep.mubr.msk.f32.mxu0 %vm57_vm0, %v398_v23 }
  0x1c   :  { %924 = vmatmul.mubr.msk.f32.gmra.mrb[8].mxu1 %vm57_vm0, %v44_v24 }
  0x1d   :  { %991 = vmatmul.mubr.msk.f32.gmra.mrb[8].mxu0 %vm57_vm0, %v399_v25  ;;  %926 = vmatprep.mubr.msk.f32.mxu1 %vm57_vm0, %v45_v26 }
  0x1e   :  { %993 = vmatprep.mubr.msk.f32.mxu0 %vm57_vm0, %v400_v27 }
  0x20   :  { %927 = vmatmul.mubr.msk.f32.gmra.mrb[10].mxu1 %vm57_vm0, %v46_v28 }
  0x21   :  { %994 = vmatmul.mubr.msk.f32.gmra.mrb[10].mxu0 %vm57_vm0, %v401_v29  ;;  %929 = vmatprep.mubr.msk.f32.mxu1 %vm57_vm0, %v47_v30 }
  0x22   :  { %996 = vmatprep.mubr.msk.f32.mxu0 %vm57_vm0, %v402_v31 }
  0x24   :  { %930 = vmatmul.mubr.msk.f32.gmra.mrb[12].mxu1 %vm57_vm0, %v48_v32 }
  0x25   :  { %997 = vmatmul.mubr.msk.f32.gmra.mrb[12].mxu0 %vm57_vm0, %v403_v33  ;;  %932 = vmatprep.mubr.msk.f32.mxu1 %vm57_vm0, %v49_v34 }
  0x26   :  { %999 = vmatprep.mubr.msk.f32.mxu0 %vm57_vm0, %v404_v35 }
  0x28   :  { %933 = vmatmul.mubr.msk.f32.gmra.mrb[14].mxu1 %vm57_vm0, %v50_v36 }
  0x29   :  { %1000 = vmatmul.mubr.msk.f32.gmra.mrb[14].mxu0 %vm57_vm0, %v405_v37  ;;  %967 = vmatprep.mubr.msk.f32.mxu1 %vm1235_vm1, %v1236_v39 }
  0x2a   :  { %1034 = vmatprep.mubr.msk.f32.mxu0 %vm1235_vm1, %v1236_v39 }
  0xdf   :  { %v913_v41 = vpop.f32.mrb[0].mxu1 }
  0xe0   :  { %v980_v42 = vpop.f32.mrb[0].mxu0  ;;  %v178_v43 = vadd.f32 %v913_v41, %v1424_v40  ;;  %v172_v45 = vpop.f32.mrb[1].mxu1 }
  0xe1   :  { %v526_v44 = vadd.f32 %v980_v42, %v1424_v40  ;;  %v520_v46 = vpop.f32.mrb[1].mxu0  ;;  %v173_v47 = vadd.f32 %v1424_v40, %v172_v45 }
  0xe2   :  { %v521_v48 = vadd.f32 %v1424_v40, %v520_v46  ;;  %1122 = vtanh.f32 %v178_v43 }
  0xe3   :  { %1124 = vtanh.f32 %v526_v44  ;;  %v916_v49 = vpop.f32.mrb[2].mxu1 }
  0xe4   :  { %v983_v50 = vpop.f32.mrb[2].mxu0  ;;  %1126 = vtanh.f32 %v173_v47  ;;  %v188_v51 = vadd.f32 %v916_v49, %v1424_v40  ;;  %v182_v53 = vpop.f32.mrb[3].mxu1 }
  0xe5   :  { %v536_v52 = vadd.f32 %v983_v50, %v1424_v40  ;;  %v530_v54 = vpop.f32.mrb[3].mxu0  ;;  %1128 = vtanh.f32 %v521_v48  ;;  %v183_v55 = vadd.f32 %v1424_v40, %v182_v53 }
  0xe6   :  { %v531_v56 = vadd.f32 %v1424_v40, %v530_v54  ;;  %1130 = vtanh.f32 %v188_v51 }
  0xe7   :  { %1132 = vtanh.f32 %v536_v52  ;;  %v919_v57 = vpop.f32.mrb[4].mxu1 }
  0xe8   :  { %v986_v58 = vpop.f32.mrb[4].mxu0  ;;  %1134 = vtanh.f32 %v183_v55  ;;  %v198_v59 = vadd.f32 %v919_v57, %v1424_v40  ;;  %v192_v61 = vpop.f32.mrb[5].mxu1 }
  0xe9   :  { %v546_v60 = vadd.f32 %v986_v58, %v1424_v40  ;;  %v540_v62 = vpop.f32.mrb[5].mxu0  ;;  %1136 = vtanh.f32 %v531_v56  ;;  %v193_v63 = vadd.f32 %v1424_v40, %v192_v61 }
  0xea   :  { %v541_v0 = vadd.f32 %v1424_v40, %v540_v62  ;;  %1138 = vtanh.f32 %v198_v59 }
  0xeb   :  { %1140 = vtanh.f32 %v546_v60  ;;  %v922_v1 = vpop.f32.mrb[6].mxu1 }
  0xec   :  { %v989_v2 = vpop.f32.mrb[6].mxu0  ;;  %v1123_v3 = vpop.eup %1122  ;;  %1142 = vtanh.f32 %v193_v63  ;;  %v208_v4 = vadd.f32 %v922_v1, %v1424_v40 }
  0xed   :  { %v556_v5 = vadd.f32 %v989_v2, %v1424_v40  ;;  %v202_v6 = vpop.f32.mrb[7].mxu1  ;;  %v550_v7 = vpop.f32.mrb[7].mxu0  ;;  %1144 = vtanh.f32 %v541_v0 }
  0xee   :  { %v1125_v8 = vpop.eup %1124  ;;  %v203_v9 = vadd.f32 %v1424_v40, %v202_v6  ;;  %v551_v10 = vadd.f32 %v1424_v40, %v550_v7  ;;  %1146 = vtanh.f32 %v208_v4 }
  0xef   :  { %v1127_v11 = vpop.eup %1126  ;;  %1148 = vtanh.f32 %v556_v5  ;;  %v925_v15 = vpop.f32.mrb[8].mxu1 }
  0xf0   :  { %v1129_v13 = vpop.eup %1128  ;;  %v1046_v14 = vpack.c.bf16 %v1123_v3, %v1127_v11  ;;  %v992_v16 = vpop.f32.mrb[8].mxu0  ;;  %1150 = vtanh.f32 %v203_v9  ;;  %v218_v19 = vadd.f32 %v925_v15, %v1424_v40 }
  0xf1   :  { %v1131_v17 = vpop.eup %1130  ;;  %v1086_v18 = vpack.c.bf16 %v1125_v8, %v1129_v13  ;;  %v566_v20 = vadd.f32 %v992_v16, %v1424_v40  ;;  %v212_v21 = vpop.f32.mrb[9].mxu1  ;;  %1152 = vtanh.f32 %v551_v10 }
  0xf2   :  { %v560_v22 = vpop.f32.mrb[9].mxu0  ;;  %v1133_v23 = vpop.eup %1132  ;;  %1048 = vmatpush3.bf16.xpose.msk.msra.mxu1 %vm1444_vm2, %v1046_v14  ;;  %v213_v24 = vadd.f32 %v1424_v40, %v212_v21  ;;  %1154 = vtanh.f32 %v218_v19 }
  0xf3   :  { %v561_v25 = vadd.f32 %v1424_v40, %v560_v22  ;;  %v1135_v26 = vpop.eup %1134  ;;  %1088 = vmatpush3.bf16.xpose.msk.msra.mxu0 %vm1444_vm2, %v1086_v18  ;;  %1049 = vmatprep.subr.bf16.mxu1 %v1234_v38  ;;  %1156 = vtanh.f32 %v566_v20  ;;  %v928_v29 = vpop.f32.mrb[10].mxu1 }
  0xf4   :  { %v1137_v27 = vpop.eup %1136  ;;  %1089 = vmatprep.subr.bf16.mxu0 %v1234_v38  ;;  %v1050_v28 = vpack.c.bf16 %v1131_v17, %v1135_v26  ;;  %v995_v30 = vpop.f32.mrb[10].mxu0  ;;  %1158 = vtanh.f32 %v213_v24  ;;  %v228_v33 = vadd.f32 %v928_v29, %v1424_v40  ;;  %v267_v29 = vstv %s1555_s5 }
  0xf5   :  { %v1139_v31 = vpop.eup %1138  ;;  %v1090_v32 = vpack.c.bf16 %v1133_v23, %v1137_v27  ;;  %v576_v34 = vadd.f32 %v995_v30, %v1424_v40  ;;  %v222_v35 = vpop.f32.mrb[11].mxu1  ;;  %1160 = vtanh.f32 %v561_v25 }
  0xf6   :  { %v570_v36 = vpop.f32.mrb[11].mxu0  ;;  %v1141_v37 = vpop.eup %1140  ;;  %v223_v39 = vadd.f32 %v1424_v40, %v222_v35  ;;  %1162 = vtanh.f32 %v228_v33 }
  0xf7   :  { %v571_v41 = vadd.f32 %v1424_v40, %v570_v36  ;;  %v1143_v42 = vpop.eup %1142  ;;  %1164 = vtanh.f32 %v576_v34  ;;  %v931_v45 = vpop.f32.mrb[12].mxu1 }
  0xf8   :  { %v1145_v43 = vpop.eup %1144  ;;  %v1054_v44 = vpack.c.bf16 %v1139_v31, %v1143_v42  ;;  %v998_v46 = vpop.f32.mrb[12].mxu0  ;;  %1166 = vtanh.f32 %v223_v39  ;;  %v238_v49 = vadd.f32 %v931_v45, %v1424_v40 }
  0xf9   :  { %v1147_v47 = vpop.eup %1146  ;;  %v1094_v48 = vpack.c.bf16 %v1141_v37, %v1145_v43  ;;  %v586_v50 = vadd.f32 %v998_v46, %v1424_v40  ;;  %v232_v51 = vpop.f32.mrb[13].mxu1  ;;  %1168 = vtanh.f32 %v571_v41 }
  0xfa   :  { %v580_v52 = vpop.f32.mrb[13].mxu0  ;;  %v1149_v53 = vpop.eup %1148  ;;  %1052 = vmatpush3.bf16.xpose.msk.msra.mxu1 %vm1444_vm2, %v1050_v28  ;;  %v233_v54 = vadd.f32 %v1424_v40, %v232_v51  ;;  %1170 = vtanh.f32 %v238_v49  ;;  %v33_v28 = vld [vmem:[%s1554_s4] sm:$0x1]  ;;  %s1186_s4 = scalar_lea.vmem %s741_s28, 16 }
  0xfb   :  { %v581_v55 = vadd.f32 %v1424_v40, %v580_v52  ;;  %v1151_v56 = vpop.eup %1150  ;;  %1092 = vmatpush3.bf16.xpose.msk.msra.mxu0 %vm1444_vm2, %v1090_v32  ;;  %1053 = vmatprep.subr.bf16.mxu1 %v1234_v38  ;;  %1172 = vtanh.f32 %v586_v50  ;;  %v934_v59 = vpop.f32.mrb[14].mxu1  ;;  %p1187_p0 = scmp.ne.s32.totalorder %s741_s28, %s1186_s4  ;;  %p1192_p2 = scmp.lt.s32.totalorder %s1190_s8, %s1186_s4 }
  0xfc   :  { %v1153_v57 = vpop.eup %1152  ;;  %1093 = vmatprep.subr.bf16.mxu0 %v1234_v38  ;;  %v1058_v58 = vpack.c.bf16 %v1147_v47, %v1151_v56  ;;  %v1001_v60 = vpop.f32.mrb[14].mxu0  ;;  %1174 = vtanh.f32 %v233_v54  ;;  %v248_v63 = vadd.f32 %v934_v59, %v1424_v40 }
  0xfd   :  { %v1155_v61 = vpop.eup %1154  ;;  %v1098_v62 = vpack.c.bf16 %v1149_v53, %v1153_v57  ;;  %v596_v0 = vadd.f32 %v1001_v60, %v1424_v40  ;;  %v242_v1 = vpop.f32.mrb[15].mxu1  ;;  %1176 = vtanh.f32 %v581_v55  ;;  %p1193_p3 = por %p1192_p2, %p1191_p1 }
  0xfe   :  { %v590_v2 = vpop.f32.mrb[15].mxu0  ;;  %v1157_v3 = vpop.eup %1156  ;;  %v243_v4 = vadd.f32 %v1424_v40, %v242_v1  ;;  %1178 = vtanh.f32 %v248_v63 }
  0xff   :  { %v591_v5 = vadd.f32 %v1424_v40, %v590_v2  ;;  %v1159_v6 = vpop.eup %1158  ;;  %1180 = vtanh.f32 %v596_v0  ;;  %p1194_p4 = pnand %p1193_p3, %p1187_p0 }
 0x100   :  { %v1161_v7 = vpop.eup %1160  ;;  %v1062_v8 = vpack.c.bf16 %v1155_v61, %v1159_v6  ;;  %1182 = vtanh.f32 %v243_v4 }
 0x101   :  { %v1163_v9 = vpop.eup %1162  ;;  %v1102_v10 = vpack.c.bf16 %v1157_v3, %v1161_v7  ;;  %1184 = vtanh.f32 %v591_v5 }
 0x102   :  { %v1165_v11 = vpop.eup %1164  ;;  %1056 = vmatpush3.bf16.xpose.msk.msra.mxu1 %vm1444_vm2, %v1054_v44 }
 0x103   :  { %v1167_v13 = vpop.eup %1166  ;;  %1096 = vmatpush3.bf16.xpose.msk.msra.mxu0 %vm1444_vm2, %v1094_v48  ;;  %1057 = vmatprep.subr.bf16.mxu1 %v1234_v38 }
 0x104   :  { %v1169_v40 = vpop.eup %1168  ;;  %1097 = vmatprep.subr.bf16.mxu0 %v1234_v38  ;;  %v1066_v14 = vpack.c.bf16 %v1163_v9, %v1167_v13 }
 0x105   :  { %v1171_v15 = vpop.eup %1170  ;;  %v1106_v16 = vpack.c.bf16 %v1165_v11, %v1169_v40 }
 0x106   :  { %v1173_v17 = vpop.eup %1172 }
 0x107   :  { %v1175_v18 = vpop.eup %1174 }
 0x108   :  { %v1177_v19 = vpop.eup %1176  ;;  %v1070_v20 = vpack.c.bf16 %v1171_v15, %v1175_v18 }
 0x109   :  { %v1179_v21 = vpop.eup %1178  ;;  %v1110_v22 = vpack.c.bf16 %v1173_v17, %v1177_v19 }
 0x10a   :  { %v1181_v23 = vpop.eup %1180  ;;  %1060 = vmatpush3.bf16.xpose.msk.msra.mxu1 %vm1444_vm2, %v1058_v58 }
 0x10b   :  { %v1183_v24 = vpop.eup %1182  ;;  %1100 = vmatpush3.bf16.xpose.msk.msra.mxu0 %vm1444_vm2, %v1098_v62  ;;  %1061 = vmatprep.subr.bf16.mxu1 %v1234_v38 }
 0x10c   :  { %v1185_v25 = vpop.eup %1184  ;;  %1101 = vmatprep.subr.bf16.mxu0 %v1234_v38  ;;  %v1074_v26 = vpack.c.bf16 %v1179_v21, %v1183_v24 }
 0x10d   :  { %v1114_v27 = vpack.c.bf16 %v1181_v23, %v1185_v25 }
 0x112   :  { %1064 = vmatpush3.bf16.xpose.msk.msra.mxu1 %vm1444_vm2, %v1062_v8 }
 0x113   :  { %1104 = vmatpush3.bf16.xpose.msk.msra.mxu0 %vm1444_vm2, %v1102_v10  ;;  %1065 = vmatprep.subr.bf16.mxu1 %v1234_v38 }
 0x114   :  { %1105 = vmatprep.subr.bf16.mxu0 %v1234_v38 }
 0x11a   :  { %1068 = vmatpush3.bf16.xpose.msk.msra.mxu1 %vm1444_vm2, %v1066_v14 }
 0x11b   :  { %1108 = vmatpush3.bf16.xpose.msk.msra.mxu0 %vm1444_vm2, %v1106_v16  ;;  %1069 = vmatprep.subr.bf16.mxu1 %v1234_v38 }
 0x11c   :  { %1109 = vmatprep.subr.bf16.mxu0 %v1234_v38 }
 0x122   :  { %1072 = vmatpush3.bf16.xpose.msk.msra.mxu1 %vm1444_vm2, %v1070_v20 }
 0x123   :  { %1112 = vmatpush3.bf16.xpose.msk.msra.mxu0 %vm1444_vm2, %v1110_v22  ;;  %1073 = vmatprep.subr.bf16.mxu1 %v1234_v38 }
 0x124   :  { %1113 = vmatprep.subr.bf16.mxu0 %v1234_v38 }
 0x12a   :  { %1076 = vmatpush3.bf16.xpose.msk.msra.mxu1 %vm1444_vm2, %v1074_v26 }
 0x12b   :  { %1116 = vmatpush3.bf16.xpose.msk.msra.mxu0 %vm1444_vm2, %v1114_v27 }
 0x131   :  { %968 = vmatmul.mubr.msk.f32.vlgmr.msra.gmra.mrb[16].mxu1 %vm57_vm0, %v33_v28 }
 0x132   :  { %1035 = vmatmul.mubr.msk.f32.vlgmr.msra.gmra.mrb[16].mxu0 %vm57_vm0, %v33_v28 }
 0x204   :  { %v385_v38 = vpop.f32.mrb[16].mxu1 }
 0x205   :  { %v386_v30 = vadd.f32 %v385_v38, %v267_v29  ;;  %v729_v12 = vpop.f32.mrb[16].mxu0  ;;  %v969_v31 = vpop.f32.mrb[17].mxu1 }
 0x206   :  { %v730_v32 = vadd.f32 %v729_v12, %v267_v29  ;;  %v1036_v33 = vpop.f32.mrb[17].mxu0 }
 0x207   :  { %389 = vst [vmem:[#allocation3] sm:$0x1] %v386_v30 }
 0x208   :  { %733 = vst [vmem:[#allocation5] sm:$0x1] %v730_v32 }
 0x209   :  { %1197 = shalt.err (!%p1194_p4)
}
 0x20a   :  { %s1198_s10 = scalar_lea.hbm %s1556_s6, 16 }
 0x20b   :  { %p1199_p5 = scmp.ne.s32.totalorder %s1556_s6, %s1198_s10  ;;  %p1202_p6 = scmp.lt.u32.totalorder %s1198_s10, %s1556_s6 }
 0x20d   :  { %p1204_p7 = pnand %p1202_p6, %p1199_p5 }
 0x20f   :  { %1207 = shalt.err (!%p1204_p7)
}
 0x210   :  { %743 = dma.vmem_to_hbm [thread:$0]  %s741_s28, 16, %s1556_s6, [#allocation4]  }
 0x211   :  { %s1208_s16 = scalar_lea.vmem %s1518_s30, 16  ;;  %s1212_s17 = scalar_lea.vmem %s1518_s30, 32 }
 0x212   :  { %p1209_p8 = scmp.ne.s32.totalorder %s1518_s30, %s1208_s16  ;;  %p1213_p9 = scmp.lt.s32.totalorder %s1518_s30, %s1518_s30 }
 0x213   :  { %p1214_p10 = scmp.lt.s32.totalorder %s1212_s17, %s1208_s16 }
 0x215   :  { %p1215_p11 = por %p1214_p10, %p1213_p9 }
 0x217   :  { %p1216_p12 = pnand %p1215_p11, %p1209_p8 }
 0x219   :  { %1219 = shalt.err (!%p1216_p12)
}
 0x21a   :  { %s1220_s20 = scalar_lea.hbm %s1557_s7, 16 }
 0x21b   :  { %p1221_p13 = scmp.ne.s32.totalorder %s1557_s7, %s1220_s20  ;;  %p1224_p0 = scmp.lt.u32.totalorder %s1220_s20, %s1557_s7 }
 0x21d   :  { %p1226_p1 = pnand %p1224_p0, %p1221_p13 }
 0x21f   :  { %1229 = shalt.err (!%p1226_p1)
}
 0x220   :  { %753 = dma.vmem_to_hbm [thread:$0]  %s1518_s30, 16, %s1557_s7, [#allocation6]  }
 0x221   :  { %1230 = dma.done.wait [#allocation4], 16  }
 0x222   :  { %1231 = vsyncadd [#allocation4], 4294967280 }
 0x223   :  { %1232 = dma.done.wait [#allocation6], 16  }
 0x224   :  { %1233 = vsyncadd [#allocation6], 4294967280 }
 0x225   :  { %760 = vsyncpa [#allocation4], 1 }
 0x226   :  { %761 = vsyncpa [#allocation6], 1 }

</bundles_post_ra>
